<compile_context>
chip_gen: v7x
topology: tpu7x:2x2x1
jax: 0.10.0
libtpu: 0.0.40
codegen_flags: <defaults>
</compile_context>

<pallas_src>
import math

import jax
import jax.numpy as jnp
from jax.experimental import pallas as pl
from jax.experimental.pallas import tpu as pltpu


def _round_up(x, m):
    return ((x + m - 1) // m) * m


def _make_arcface_kernel(s, cos_m, sin_m, th, mm, easy_margin,
                         num_classes, class_tile, num_class_tiles):
    """Fused cosine matmul + ArcFace margin + streaming-CE over class tiles.

    Grid = (row_tiles, class_tiles).  The class-tile axis is a reduction
    carried in VMEM scratch (running max / sum-exp / target logit); the
    per-row loss (lse - target_logit) is written on the last class tile.
    """
    neg_big = -1e30  # finite "-inf" (avoids inf-inf NaNs in the online LSE)
    has_padding = (num_classes % class_tile) != 0
    last_ct = num_class_tiles - 1

    def kernel(x_ref, w_ref, lab_ref, loss_ref, m_sc, l_sc, t_sc):
        c_idx = pl.program_id(1)

        # ---- per-row-tile init of the streaming-LSE state ----
        @pl.when(c_idx == 0)
        def _():
            m_sc[...] = jnp.full_like(m_sc, neg_big)
            l_sc[...] = jnp.zeros_like(l_sc)
            t_sc[...] = jnp.zeros_like(t_sc)

        # ---- cosine block on the MXU: bf16 operands, f32 accumulate ----
        x_n = x_ref[...]                                             # [TM, D] bf16
        w_n = w_ref[...]                                             # [D, TC] bf16
        cosine = jnp.dot(x_n, w_n, preferred_element_type=jnp.float32)

        # ---- ArcFace margin (f32 elementwise) ----
        sine = jnp.sqrt(jnp.clip(1.0 - cosine * cosine, 0.0, 1.0))
        phi = cosine * cos_m - sine * sin_m
        if easy_margin:
            phi = jnp.where(cosine > 0.0, phi, cosine)
        else:
            phi = jnp.where(cosine > th, phi, cosine - mm)

        TM, TC = cosine.shape
        lab = lab_ref[...]                                           # [TM, 1] int32
        cls = c_idx * class_tile + jax.lax.broadcasted_iota(
            jnp.int32, (TM, TC), 1)
        is_target = cls == lab
        out = jnp.where(is_target, phi, cosine) * s                  # scaled logits

        # ---- streaming logsumexp + target-logit accumulation ----
        def accumulate(vals):
            m_prev = m_sc[...]                                       # [TM, 1]
            m_new = jnp.maximum(m_prev, jnp.max(vals, axis=1, keepdims=True))
            alpha = jnp.exp(m_prev - m_new)
            p = jnp.exp(vals - m_new)
            l_sc[...] = alpha * l_sc[...] + jnp.sum(p, axis=1, keepdims=True)
            t_sc[...] = t_sc[...] + jnp.sum(
                jnp.where(is_target, vals, 0.0), axis=1, keepdims=True)
            m_sc[...] = m_new

        if not has_padding:
            accumulate(out)
        elif num_class_tiles == 1:
            # Only tile is the last tile; mask padded (non-existent) classes.
            accumulate(jnp.where(cls < num_classes, out, neg_big))
        else:
            # Padded classes only exist in the final class tile; every other
            # tile skips the compare/select entirely.
            @pl.when(c_idx == last_ct)
            def _():
                accumulate(jnp.where(cls < num_classes, out, neg_big))

            @pl.when(c_idx != last_ct)
            def _():
                accumulate(out)

        # ---- finalize: per-row cross-entropy for this row tile ----
        @pl.when(c_idx == last_ct)
        def _():
            lse = m_sc[...] + jnp.log(l_sc[...])                     # [TM, 1]
            loss_ref[...] = lse - t_sc[...]                          # [TM, 1]

    return kernel


class ArcMarginProductPallas:
    def __init__(self, in_features, out_features, s=30.0, m=0.5,
                 easy_margin=False, key=None):
        self.in_features = in_features
        self.out_features = out_features
        self.s = s
        self.m = m
        self.easy_margin = easy_margin
        self.cos_m = math.cos(m)
        self.sin_m = math.sin(m)
        self.th = math.cos(math.pi - m)
        self.mm = math.sin(math.pi - m) * m

        # xavier_uniform_ on weight [out_features, in_features]
        if key is None:
            key = jax.random.PRNGKey(0)
        bound = math.sqrt(6.0 / (in_features + out_features))
        self.weight = jax.random.uniform(
            key, (out_features, in_features), dtype=jnp.float32,
            minval=-bound, maxval=bound)

        # Class tile: multiple of 128 (lane-aligned), up to 2048, capped so the
        # double-buffered bf16 W^T tile stays within a conservative VMEM budget
        # (v7x only has 64 MiB physical / 32 MiB default scoped VMEM).
        max_w_tile_bytes = 12 << 20                       # per-buffer budget
        tc_budget = max(128, (max_w_tile_bytes // max(1, in_features * 2))
                        // 128 * 128)
        self.class_tile = int(min(2048, tc_budget,
                                  _round_up(out_features, 128)))
        self.c_pad = _round_up(out_features, self.class_tile)
        self.num_class_tiles = self.c_pad // self.class_tile
        # Every class tile must contain at least one real class, otherwise the
        # streaming-LSE max would stay at the -1e30 sentinel.
        assert self.c_pad - self.class_tile < out_features

        self._kernel = _make_arcface_kernel(
            self.s, self.cos_m, self.sin_m, self.th, self.mm,
            self.easy_margin, out_features, self.class_tile,
            self.num_class_tiles)

    # ---- shared preprocessing (wrapper-side, plain XLA ops) ----
    def _normalized_weight_t_bf16(self):
        # Normalize the LIVE weight every forward (PyTorch normalizes each
        # call), transpose to [D, C] for a lane-dense [M,D]@[D,C] matmul,
        # pad the class axis, cast to bf16 for the MXU.
        w = self.weight.astype(jnp.float32)
        wsq = jnp.sum(w * w, axis=1, keepdims=True)
        w_n = w * jax.lax.rsqrt(jnp.maximum(wsq, 1e-24))   # 1/max(|w|,1e-12)
        w_t = jnp.transpose(w_n)                           # [D, C]
        if self.c_pad != self.out_features:
            w_t = jnp.pad(w_t, ((0, 0), (0, self.c_pad - self.out_features)))
        return w_t.astype(jnp.bfloat16)                    # [D, C_pad]

    def forward(self, inputs, labels):
        # Mirrors the PyTorch forward: uses labels[0] for every input and
        # sums the per-input mean cross-entropy losses.
        label = jnp.asarray(labels[0], jnp.int32)           # [B]
        xs = [jnp.asarray(t, jnp.float32) for t in inputs]
        N = len(xs)
        B, D = xs[0].shape
        M = N * B

        # Fold the input list into the matmul M dimension; normalize rows
        # (F.normalize, eps=1e-12) in f32, cast to bf16 for the MXU.
        x_all = jnp.concatenate(xs, axis=0)                  # [M, D]
        sumsq = jnp.sum(x_all * x_all, axis=1, keepdims=True)
        x_n = (x_all * jax.lax.rsqrt(jnp.maximum(sumsq, 1e-24))
               ).astype(jnp.bfloat16)

        w_t = self._normalized_weight_t_bf16()               # [D, C_pad] bf16

        # Row tiling (M is the matmul M dim; 256 rows feeds the MXU natively).
        TM = 256 if M >= 256 else _round_up(M, 8)
        M_pad = _round_up(M, TM)
        if M_pad != M:
            x_n = jnp.pad(x_n, ((0, M_pad - M), (0, 0)))
        lab_all = jnp.tile(label, N)                          # same label per input
        if M_pad != M:
            lab_all = jnp.pad(lab_all, (0, M_pad - M))
        lab2d = lab_all.reshape(M_pad, 1)

        TC = self.class_tile
        n_ct = self.num_class_tiles
        n_rt = M_pad // TM

        # Explicit VMEM limit: double-buffered x/W/labels/output tiles,
        # scratch accumulators, plus headroom for [TM, TC] f32 temporaries.
        tile_bytes = (2 * TM * D * 2          # x tile (bf16), double-buffered
                      + 2 * D * TC * 2        # W^T tile (bf16), double-buffered
                      + 2 * TM * 4            # labels (int32)
                      + 2 * TM * 4            # per-row loss output
                      + 3 * TM * 4)           # scratch accumulators
        vmem_limit = int(min(96 * (1 << 20),
                             max(32 * (1 << 20),
                                 tile_bytes + 6 * TM * TC * 4)))

        per_row = pl.pallas_call(
            self._kernel,
            out_shape=jax.ShapeDtypeStruct((M_pad, 1), jnp.float32),
            grid_spec=pltpu.PrefetchScalarGridSpec(
                num_scalar_prefetch=0,
                grid=(n_rt, n_ct),
                in_specs=[
                    pl.BlockSpec((TM, D), lambda r, c: (r, 0)),   # x (bf16)
                    pl.BlockSpec((D, TC), lambda r, c: (0, c)),   # W^T (bf16)
                    pl.BlockSpec((TM, 1), lambda r, c: (r, 0)),   # labels
                ],
                out_specs=pl.BlockSpec((TM, 1), lambda r, c: (r, 0)),
                scratch_shapes=[
                    pltpu.VMEM((TM, 1), jnp.float32),   # running max
                    pltpu.VMEM((TM, 1), jnp.float32),   # running sum-exp
                    pltpu.VMEM((TM, 1), jnp.float32),   # target logit
                ],
            ),
            compiler_params=pltpu.CompilerParams(
                dimension_semantics=("parallel", "arbitrary"),
                vmem_limit_bytes=vmem_limit),
        )(x_n, w_t, lab2d)

        # Per-input mean CE, summed over inputs == sum of real rows / B.
        per_row = per_row[:M, 0]
        return jnp.sum(per_row) / B

    # Pure-JAX reference with the SAME bf16 cosine path (for validation).
    def reference(self, inputs, labels):
        label = jnp.asarray(labels[0], jnp.int32)
        w = self._normalized_weight_t_bf16()[:, :self.out_features]
        total = jnp.float32(0.0)
        for t in inputs:
            xf = jnp.asarray(t, jnp.float32)
            sumsq = jnp.sum(xf * xf, axis=1, keepdims=True)
            xn = (xf * jax.lax.rsqrt(jnp.maximum(sumsq, 1e-24))
                  ).astype(jnp.bfloat16)
            cosine = jnp.dot(xn, w, preferred_element_type=jnp.float32)
            sine = jnp.sqrt(jnp.clip(1.0 - cosine * cosine, 0.0, 1.0))
            phi = cosine * self.cos_m - sine * self.sin_m
            if self.easy_margin:
                phi = jnp.where(cosine > 0.0, phi, cosine)
            else:
                phi = jnp.where(cosine > self.th, phi, cosine - self.mm)
            one_hot = jax.nn.one_hot(label, self.out_features, dtype=jnp.float32)
            out = (one_hot * phi + (1.0 - one_hot) * cosine) * self.s
            lse = jax.scipy.special.logsumexp(out, axis=1)
            tgt = jnp.sum(one_hot * out, axis=1)
            total = total + jnp.mean(lse - tgt)
        return total


if __name__ == "__main__":
    key = jax.random.PRNGKey(0)
    k_w, k_x0, k_x1, k_lab = jax.random.split(key, 4)

    B = 8
    in_features = 32
    out_features = 16

    module = ArcMarginProductPallas(in_features, out_features,
                                    s=30.0, m=0.5, easy_margin=False, key=k_w)

    x0 = jax.random.normal(k_x0, (B, in_features), dtype=jnp.float32)
    x1 = jax.random.normal(k_x1, (B, in_features), dtype=jnp.float32)
    labels0 = jax.random.randint(k_lab, (B,), 0, out_features, dtype=jnp.int32)

    inputs = [x0, x1]
    labels = [labels0]

    loss = module.forward(inputs, labels)
    jax.block_until_ready(loss)

    ref = module.reference(inputs, labels)
    jax.block_until_ready(ref)
    if not jnp.allclose(loss, ref, rtol=5e-3, atol=5e-3):
        raise AssertionError(f"mismatch: kernel={float(loss)} ref={float(ref)}")

    print("KERNEL_OK")
</pallas_src>

<mosaic_0001>
module attributes {stable_mosaic.version = 11 : i64} {
  func.func @kernel(%arg0: i32, %arg1: i32, %arg2: memref<16x32xbf16, #tpu.memory_space<vmem>>, %arg3: memref<32x128xbf16, #tpu.memory_space<vmem>>, %arg4: memref<16x1xi32, #tpu.memory_space<vmem>>, %arg5: memref<16x1xf32, #tpu.memory_space<vmem>>, %arg6: memref<16x1xf32, #tpu.memory_space<vmem>>, %arg7: memref<16x1xf32, #tpu.memory_space<vmem>>, %arg8: memref<16x1xf32, #tpu.memory_space<vmem>>) attributes {dimension_semantics = [#tpu.dimension_semantics<parallel>, #tpu.dimension_semantics<arbitrary>], iteration_bounds = array<i64: 1, 1>, scalar_prefetch = 0 : i64, scratch_operands = 3 : i64, tpu.core_type = #tpu.core_type<tc>, window_params = [{transform_indices = @transform_0, window_bounds = array<i64: 16, 32>}, {transform_indices = @transform_1, window_bounds = array<i64: 32, 128>}, {transform_indices = @transform_2, window_bounds = array<i64: 16, 1>}, {transform_indices = @transform_3, window_bounds = array<i64: 16, 1>}]} {
    %c0_i32 = arith.constant 0 : i32
    %0 = arith.cmpi eq, %arg1, %c0_i32 : i32
    %1 = arith.extui %0 : i1 to i32
    %c0_i32_0 = arith.constant 0 : i32
    %2 = arith.cmpi ne, %1, %c0_i32_0 : i32
    scf.if %2 {
      %cst_33 = arith.constant -1.000000e+30 : f32
      %64 = vector.broadcast %cst_33 : f32 to vector<16x1xf32>
      %c0_34 = arith.constant 0 : index
      %c0_35 = arith.constant 0 : index
      %65 = vector.load %arg6[%c0_34, %c0_35] : memref<16x1xf32, #tpu.memory_space<vmem>>, vector<16x1xf32>
      tpu.vector_store %arg6[%c0_34, %c0_35], %64 {strides = array<i32>} : memref<16x1xf32, #tpu.memory_space<vmem>>, vector<16x1xf32>,
      %cst_36 = arith.constant 0.000000e+00 : f32
      %66 = vector.broadcast %cst_36 : f32 to vector<16x1xf32>
      %c0_37 = arith.constant 0 : index
      %c0_38 = arith.constant 0 : index
      %67 = vector.load %arg7[%c0_37, %c0_38] : memref<16x1xf32, #tpu.memory_space<vmem>>, vector<16x1xf32>
      tpu.vector_store %arg7[%c0_37, %c0_38], %66 {strides = array<i32>} : memref<16x1xf32, #tpu.memory_space<vmem>>, vector<16x1xf32>,
      %cst_39 = arith.constant 0.000000e+00 : f32
      %68 = vector.broadcast %cst_39 : f32 to vector<16x1xf32>
      %c0_40 = arith.constant 0 : index
      %c0_41 = arith.constant 0 : index
      %69 = vector.load %arg8[%c0_40, %c0_41] : memref<16x1xf32, #tpu.memory_space<vmem>>, vector<16x1xf32>
      tpu.vector_store %arg8[%c0_40, %c0_41], %68 {strides = array<i32>} : memref<16x1xf32, #tpu.memory_space<vmem>>, vector<16x1xf32>,
    } else {
    }
    %c0 = arith.constant 0 : index
    %c0_1 = arith.constant 0 : index
    %3 = vector.load %arg2[%c0, %c0_1] : memref<16x32xbf16, #tpu.memory_space<vmem>>, vector<16x32xbf16>
    %c0_2 = arith.constant 0 : index
    %c0_3 = arith.constant 0 : index
    %4 = vector.load %arg3[%c0_2, %c0_3] : memref<32x128xbf16, #tpu.memory_space<vmem>>, vector<32x128xbf16>
    %cst = arith.constant dense<0.000000e+00> : vector<16x128xf32>
    %5 = tpu.matmul %3, %4, %cst {dimension_numbers = #tpu.dot_dimension_numbers<[1], [0], [0], [1], [0, 0, 1, 1], [], []>} : vector<16x32xbf16>, vector<32x128xbf16>, vector<16x128xf32> -> vector<16x128xf32>
    %6 = arith.mulf %5, %5 : vector<16x128xf32>
    %cst_4 = arith.constant 1.000000e+00 : f32
    %7 = vector.broadcast %cst_4 : f32 to vector<16x128xf32>
    %8 = arith.subf %7, %6 : vector<16x128xf32>
    %cst_5 = arith.constant 0.000000e+00 : f32
    %cst_6 = arith.constant 1.000000e+00 : f32
    %9 = vector.broadcast %cst_5 : f32 to vector<16x128xf32>
    %10 = arith.maximumf %9, %8 : vector<16x128xf32>
    %11 = vector.broadcast %cst_6 : f32 to vector<16x128xf32>
    %12 = arith.minimumf %11, %10 : vector<16x128xf32>
    %13 = math.sqrt %12 : vector<16x128xf32>
    %cst_7 = arith.constant 0.87758255 : f32
    %14 = vector.broadcast %cst_7 : f32 to vector<16x128xf32>
    %15 = arith.mulf %5, %14 : vector<16x128xf32>
    %cst_8 = arith.constant 0.47942555 : f32
    %16 = vector.broadcast %cst_8 : f32 to vector<16x128xf32>
    %17 = arith.mulf %13, %16 : vector<16x128xf32>
    %18 = arith.subf %15, %17 : vector<16x128xf32>
    %cst_9 = arith.constant -0.87758255 : f32
    %19 = vector.broadcast %cst_9 : f32 to vector<16x128xf32>
    %20 = arith.cmpf ogt, %5, %19 : vector<16x128xf32>
    %cst_10 = arith.constant 0.239712775 : f32
    %21 = vector.broadcast %cst_10 : f32 to vector<16x128xf32>
    %22 = arith.subf %5, %21 : vector<16x128xf32>
    %23 = arith.select %20, %18, %22 : vector<16x128xi1>, vector<16x128xf32>
    %c0_11 = arith.constant 0 : index
    %c0_12 = arith.constant 0 : index
    %24 = vector.load %arg4[%c0_11, %c0_12] : memref<16x1xi32, #tpu.memory_space<vmem>>, vector<16x1xi32>
    %c128_i32 = arith.constant 128 : i32
    %25 = arith.muli %arg1, %c128_i32 : i32
    %26 = tpu.iota {dimensions = array<i32: 1>} : vector<16x128xi32>
    %27 = vector.broadcast %25 : i32 to vector<16x128xi32>
    %28 = arith.addi %27, %26 : vector<16x128xi32>
    %29 = vector.broadcast %24 : vector<16x1xi32> to vector<16x128xi32>
    %30 = arith.cmpi eq, %28, %29 : vector<16x128xi32>
    %31 = arith.select %30, %23, %5 : vector<16x128xi1>, vector<16x128xf32>
    %cst_13 = arith.constant 3.000000e+01 : f32
    %32 = vector.broadcast %cst_13 : f32 to vector<16x128xf32>
    %33 = arith.mulf %31, %32 : vector<16x128xf32>
    %c16_i32 = arith.constant 16 : i32
    %34 = vector.broadcast %c16_i32 : i32 to vector<16x128xi32>
    %35 = arith.cmpi slt, %28, %34 : vector<16x128xi32>
    %cst_14 = arith.constant -1.000000e+30 : f32
    %36 = vector.broadcast %cst_14 : f32 to vector<16x128xf32>
    %37 = arith.select %35, %33, %36 : vector<16x128xi1>, vector<16x128xf32>
    %c0_15 = arith.constant 0 : index
    %c0_16 = arith.constant 0 : index
    %38 = vector.load %arg6[%c0_15, %c0_16] : memref<16x1xf32, #tpu.memory_space<vmem>>, vector<16x1xf32>
    %cst_17 = arith.constant dense<0xFF800000> : vector<16xf32>
    %39 = vector.multi_reduction <maximumf>, %37, %cst_17 [1] : vector<16x128xf32> to vector<16xf32>
    %40 = vector.shape_cast %39 : vector<16xf32> to vector<16x1xf32>
    %41 = arith.maximumf %38, %40 : vector<16x1xf32>
    %42 = arith.subf %38, %41 : vector<16x1xf32>
    %43 = math.exp %42 : vector<16x1xf32>
    %44 = vector.broadcast %41 : vector<16x1xf32> to vector<16x128xf32>
    %45 = arith.subf %37, %44 : vector<16x128xf32>
    %46 = math.exp %45 : vector<16x128xf32>
    %c0_18 = arith.constant 0 : index
    %c0_19 = arith.constant 0 : index
    %47 = vector.load %arg7[%c0_18, %c0_19] : memref<16x1xf32, #tpu.memory_space<vmem>>, vector<16x1xf32>
    %48 = arith.mulf %43, %47 : vector<16x1xf32>
    %cst_20 = arith.constant dense<0.000000e+00> : vector<16xf32>
    %49 = vector.multi_reduction <add>, %46, %cst_20 [1] : vector<16x128xf32> to vector<16xf32>
    %50 = vector.shape_cast %49 : vector<16xf32> to vector<16x1xf32>
    %51 = arith.addf %48, %50 : vector<16x1xf32>
    %c0_21 = arith.constant 0 : index
    %c0_22 = arith.constant 0 : index
    %52 = vector.load %arg7[%c0_21, %c0_22] : memref<16x1xf32, #tpu.memory_space<vmem>>, vector<16x1xf32>
    tpu.vector_store %arg7[%c0_21, %c0_22], %51 {strides = array<i32>} : memref<16x1xf32, #tpu.memory_space<vmem>>, vector<16x1xf32>,
    %c0_23 = arith.constant 0 : index
    %c0_24 = arith.constant 0 : index
    %53 = vector.load %arg8[%c0_23, %c0_24] : memref<16x1xf32, #tpu.memory_space<vmem>>, vector<16x1xf32>
    %cst_25 = arith.constant 0.000000e+00 : f32
    %54 = vector.broadcast %cst_25 : f32 to vector<16x128xf32>
    %55 = arith.select %30, %37, %54 : vector<16x128xi1>, vector<16x128xf32>
    %cst_26 = arith.constant dense<0.000000e+00> : vector<16xf32>
    %56 = vector.multi_reduction <add>, %55, %cst_26 [1] : vector<16x128xf32> to vector<16xf32>
    %57 = vector.shape_cast %56 : vector<16xf32> to vector<16x1xf32>
    %58 = arith.addf %53, %57 : vector<16x1xf32>
    %c0_27 = arith.constant 0 : index
    %c0_28 = arith.constant 0 : index
    %59 = vector.load %arg8[%c0_27, %c0_28] : memref<16x1xf32, #tpu.memory_space<vmem>>, vector<16x1xf32>
    tpu.vector_store %arg8[%c0_27, %c0_28], %58 {strides = array<i32>} : memref<16x1xf32, #tpu.memory_space<vmem>>, vector<16x1xf32>,
    %c0_29 = arith.constant 0 : index
    %c0_30 = arith.constant 0 : index
    %60 = vector.load %arg6[%c0_29, %c0_30] : memref<16x1xf32, #tpu.memory_space<vmem>>, vector<16x1xf32>
    tpu.vector_store %arg6[%c0_29, %c0_30], %41 {strides = array<i32>} : memref<16x1xf32, #tpu.memory_space<vmem>>, vector<16x1xf32>,
    %c0_i32_31 = arith.constant 0 : i32
    %61 = arith.cmpi eq, %arg1, %c0_i32_31 : i32
    %62 = arith.extui %61 : i1 to i32
    %c0_i32_32 = arith.constant 0 : i32
    %63 = arith.cmpi ne, %62, %c0_i32_32 : i32
    scf.if %63 {
      %c0_33 = arith.constant 0 : index
      %c0_34 = arith.constant 0 : index
      %64 = vector.load %arg6[%c0_33, %c0_34] : memref<16x1xf32, #tpu.memory_space<vmem>>, vector<16x1xf32>
      %c0_35 = arith.constant 0 : index
      %c0_36 = arith.constant 0 : index
      %65 = vector.load %arg7[%c0_35, %c0_36] : memref<16x1xf32, #tpu.memory_space<vmem>>, vector<16x1xf32>
      %66 = math.log %65 : vector<16x1xf32>
      %67 = arith.addf %64, %66 : vector<16x1xf32>
      %c0_37 = arith.constant 0 : index
      %c0_38 = arith.constant 0 : index
      %68 = vector.load %arg8[%c0_37, %c0_38] : memref<16x1xf32, #tpu.memory_space<vmem>>, vector<16x1xf32>
      %69 = arith.subf %67, %68 : vector<16x1xf32>
      %c0_39 = arith.constant 0 : index
      %c0_40 = arith.constant 0 : index
      %70 = vector.load %arg5[%c0_39, %c0_40] : memref<16x1xf32, #tpu.memory_space<vmem>>, vector<16x1xf32>
      tpu.vector_store %arg5[%c0_39, %c0_40], %69 {strides = array<i32>} : memref<16x1xf32, #tpu.memory_space<vmem>>, vector<16x1xf32>,
    } else {
    }
    return
  }
  func.func @transform_0(%arg0: i32, %arg1: i32) -> (i32, i32) {
    %c0_i32 = arith.constant 0 : i32
    %c0_i32_0 = arith.constant 0 : i32
    return %arg0, %c0_i32 : i32, i32
  }
  func.func @transform_1(%arg0: i32, %arg1: i32) -> (i32, i32) {
    %c0_i32 = arith.constant 0 : i32
    %c0_i32_0 = arith.constant 0 : i32
    return %c0_i32, %arg1 : i32, i32
  }
  func.func @transform_2(%arg0: i32, %arg1: i32) -> (i32, i32) {
    %c0_i32 = arith.constant 0 : i32
    %c0_i32_0 = arith.constant 0 : i32
    return %arg0, %c0_i32 : i32, i32
  }
  func.func @transform_3(%arg0: i32, %arg1: i32) -> (i32, i32) {
    %c0_i32 = arith.constant 0 : i32
    %c0_i32_0 = arith.constant 0 : i32
    return %arg0, %c0_i32 : i32, i32
  }
}

</mosaic_0001>

<bundles_post_ra>
// kernel: tpu_custom_call.1
= control target key start
LH: loop header
LB: loop body
LE: loop exit
PB: predicated region body
PF: predicated region fallthrough
CT: control target
= control target key end

     0   :  { %8 = vsyncpa [#allocation6], 0  ;;  %s314_s12 = smov [#allocation5]   ;;  %s398_s0 = inlined_call_operand.hbm [shape: bf16[16,32], index: 0, kind: input, shape index: {}]   ;;  %s399_s1 = inlined_call_operand.vmem [shape: bf16[32,128], index: 1, kind: input, shape index: {}]   ;;  %s400_s2 = inlined_call_operand.vmem [shape: s32[16,1], index: 2, kind: input, shape index: {}]   ;;  %s401_s3 = inlined_call_operand.vmem [shape: f32[16,1], index: 3, kind: output, shape index: {}]  }
   0x1   :  { %s14_s13 = sshll.u32 %s314_s12, 4  ;;  %s290_s16 = scalar_lea.hbm %s398_s0, 128  ;;  %s15_s13 = int_to_ptr.vmem [resolvable:$true] %s14_s13 }
   0x2   :  { %p291_p0 = scmp.ne.s32.totalorder %s398_s0, %s290_s16  ;;  %p294_p1 = scmp.lt.u32.totalorder %s290_s16, %s398_s0 }
   0x4   :  { %p296_p2 = pnand %p294_p1, %p291_p0 }
   0x6   :  { %299 = shalt.err (!%p296_p2)
}
   0x7   :  { %s300_s21 = scalar_lea.vmem %s15_s13, 128  ;;  %p305_p4 = scmp.lt.s32.totalorder %s15_s13, %s15_s13 }
   0x8   :  { %p301_p3 = scmp.ne.s32.totalorder %s15_s13, %s300_s21  ;;  %p306_p5 = scmp.lt.s32.totalorder %s300_s21, %s300_s21 }
   0xa   :  { %p307_p6 = por %p306_p5, %p305_p4 }
   0xc   :  { %p308_p7 = pnand %p307_p6, %p301_p3 }
   0xe   :  { %311 = shalt.err (!%p308_p7)
}
   0xf   :  { %s315_s22 = smov 64   ;;  %s316_s23 = smov 4  }
  0x10   :  { %20 = dma.hbm_to_vmem [thread:$0]  %s398_s0, 128, %s15_s13, [#allocation6], %s315_s22, %s315_s22, %s316_s23  }
  0x11   :  { %312 = dma.done.wait [#allocation6], 128  }
  0x12   :  { %313 = vsyncadd [#allocation6], 4294967168  ;;  %v317_v0 = vmov 0.0   ;;  %vm318_vm0 = vmmov 0   ;;  %v319_v1 = vmov 0   ;;  %v271_v2 = vld [vmem:[%s399_s1] sm:$0xff]   ;;  %v145_v20 = vlaneseq }
  0x13   :  { %254 = vmatprep.subr.bf16.mxu0 %v317_v0  ;;  %258 = vmatprep.mubr.msk.bf16.mxu0 %vm318_vm0, %v317_v0  ;;  %v272_v3 = vld [vmem:[%s399_s1 + $0x8] sm:$0xff]   ;;  %v142_v4 = vld [vmem:[%s400_s2] sm:$0xff]  ;;  %v273_v5 = vld [vmem:[#allocation5] sm:$0xff]   ;;  %vm63_vm1 = vcmask 261120   ;;  %vm33_vm2 = vcmask 7168  }
  0x14   :  { %269 = vset.pattern.permute.xlu0 %v319_v1  ;;  %270 = vset.pattern.permute.xlu1 %v319_v1  ;;  %v143_v6 = vld [vmem:[%s400_s2 + $0x8] sm:$0xff]  ;;  %v320_v7 = vmov -1e+30   ;;  %36 = vst.msk [vmem:[#allocation3] sm:$0xff] %vm33_vm2, %v317_v0  ;;  %37 = vst.msk [vmem:[#allocation3 + $0x8] sm:$0xff] %vm33_vm2, %v317_v0  ;;  %v371_v24 = vand.u32 127, %v145_v20 }
  0x15   :  { %255 = vmatpush3.bf16.msra.mxu0 %v271_v2  ;;  %150 = vperm.xlu0 %269, %v142_v4   ;;  %34 = vst.msk [vmem:[#allocation2] sm:$0xff] %vm33_vm2, %v320_v7  ;;  %35 = vst.msk [vmem:[#allocation2 + $0x8] sm:$0xff] %vm33_vm2, %v320_v7 }
  0x16   :  { %256 = vmatprep.subr.bf16.mxu0 %v317_v0  ;;  %38 = vst.msk [vmem:[#allocation4] sm:$0xff] %vm33_vm2, %v317_v0  ;;  %39 = vst.msk [vmem:[#allocation4 + $0x8] sm:$0xff] %vm33_vm2, %v317_v0  ;;  %vm161_vm10 = vcmp.lt.s32.totalorder %v371_v24, 16 }
  0x19   :  { %257 = vmatpush3.bf16.msra.mxu0 %v272_v3  ;;  %153 = vperm.xlu0 %269, %v143_v6  }
  0x1b   :  { %v194_v7 = vld [vmem:[#allocation3] sm:$0xff] }
  0x1c   :  { %259 = vmatmul.mubr.msk.bf16.vlgmr.msra.gmra.mrb[0].mxu0 %vm63_vm1, %v273_v5  ;;  %v164_v50 = vld [vmem:[#allocation2] sm:$0xff]  ;;  %v165_v53 = vld [vmem:[#allocation2 + $0x8] sm:$0xff] }
  0x94   :  { %v151_v25 = vpop.permute.xlu0 %150 }
  0x95   :  { %vm155_vm7 = vcmp.eq.s32.totalorder %v371_v24, %v151_v25 }
  0x98   :  { %v154_v39 = vpop.permute.xlu0 %153 }
  0x99   :  { %vm156_vm11 = vcmp.eq.s32.totalorder %v371_v24, %v154_v39 }
  0xef   :  { %v101_v8 = vpop.f32.mrb[0].mxu0 }
  0xf0   :  { %v108_v9 = vmul.f32 %v101_v8, %v101_v8  ;;  %v260_v10 = vpop.f32.mrb[1].mxu0  ;;  %v130_v31 = vmul.f32 0.87758255, %v101_v8  ;;  %v249_v35 = vadd.f32 -0.23971277, %v101_v8 }
  0xf1   :  { %v104_v11 = vpop.f32.mrb[2].mxu0  ;;  %vm136_vm8 = vcmp.gt.f32.partialorder %v101_v8, -0.87758255 }
  0xf2   :  { %v110_v12 = vsub.f32 1.0, %v108_v9  ;;  %v109_v13 = vmul.f32 %v104_v11, %v104_v11  ;;  %v261_v14 = vpop.f32.mrb[3].mxu0  ;;  %v131_v36 = vmul.f32 0.87758255, %v104_v11  ;;  %v250_v40 = vadd.f32 -0.23971277, %v104_v11 }
  0xf3   :  { %vm137_vm9 = vcmp.gt.f32.partialorder %v104_v11, -0.87758255 }
  0xf4   :  { %v112_v15 = vmax.f32 %v110_v12, 0.0  ;;  %v111_v16 = vsub.f32 1.0, %v109_v13  ;;  %v207_v13 = vld [vmem:[#allocation4] sm:$0xff] }
  0xf6   :  { %v114_v17 = vmin.f32 %v112_v15, 1.0  ;;  %v113_v18 = vmax.f32 %v111_v16, 0.0 }
  0xf8   :  { %274 = vrsqrt.f32 %v114_v17  ;;  %v115_v19 = vmin.f32 %v113_v18, 1.0  ;;  %vm118_vm3 = vcmp.eq.f32.partialorder %v114_v17, inf  ;;  %v121_v26 = vand.u32 2147483648, %v114_v17 }
  0xf9   :  { %vm120_vm4 = vcmp.eq.f32.partialorder %v114_v17, 0.0 }
  0xfa   :  { %276 = vrsqrt.f32 %v115_v19  ;;  %vm125_vm5 = vcmp.eq.f32.partialorder %v115_v19, inf  ;;  %v128_v30 = vand.u32 2147483648, %v115_v19  ;;  %vm127_vm6 = vcmp.eq.f32.partialorder %v115_v19, 0.0 }
 0x102   :  { %v275_v21 = vpop.eup %274 }
 0x103   :  { %v117_v22 = vmul.f32 %v275_v21, %v114_v17 }
 0x104   :  { %v277_v23 = vpop.eup %276 }
 0x105   :  { %v119_v27 = vsel %vm118_vm3, %v114_v17, %v117_v22  ;;  %v124_v28 = vmul.f32 %v277_v23, %v115_v19 }
 0x106   :  { %v122_v29 = vsel %vm120_vm4, %v121_v26, %v119_v27 }
 0x107   :  { %v132_v32 = vmul.f32 0.47942555, %v122_v29  ;;  %v126_v33 = vsel %vm125_vm5, %v115_v19, %v124_v28  ;;  %v208_v19 = vld [vmem:[#allocation4 + $0x8] sm:$0xff] }
 0x108   :  { %v129_v34 = vsel %vm127_vm6, %v128_v30, %v126_v33 }
 0x109   :  { %v134_v37 = vsub.f32 %v130_v31, %v132_v32  ;;  %v133_v38 = vmul.f32 0.47942555, %v129_v34 }
 0x10b   :  { %v140_v41 = vsel %vm136_vm8, %v134_v37, %v249_v35  ;;  %v135_v42 = vsub.f32 %v131_v36, %v133_v38 }
 0x10c   :  { %v157_v43 = vsel %vm155_vm7, %v140_v41, %v101_v8 }
 0x10d   :  { %v159_v44 = vmul.f32 30.0, %v157_v43  ;;  %v141_v45 = vsel %vm137_vm9, %v135_v42, %v250_v40 }
 0x10e   :  { %v158_v46 = vsel %vm156_vm11, %v141_v45, %v104_v11  ;;  %v195_v11 = vld [vmem:[#allocation3 + $0x8] sm:$0xff] }
 0x10f   :  { %v160_v47 = vmul.f32 30.0, %v158_v46  ;;  %v162_v48 = vsel %vm161_vm10, %v159_v44, -1e+30 }
 0x110   :  { %166 = vmax.xlane.f32.xlu1 %v162_v48  ;;  %v209_v2 = vsel %vm155_vm7, %v162_v48, 0.0 }
 0x111   :  { %v163_v49 = vsel %vm161_vm10, %v160_v47, -1e+30 }
 0x112   :  { %v210_v3 = vsel %vm156_vm11, %v163_v49, 0.0 }
 0x114   :  { %168 = vmax.xlane.f32.xlu1 %v163_v49 }
 0x19d   :  { %v167_v51 = vpop.xlane.xlu1 %166 }
 0x19e   :  { %v170_v52 = vmax.f32 %v164_v50, %v167_v51 }
 0x1a0   :  { %v172_v54 = vsub.f32 %v164_v50, %v170_v52  ;;  %219 = vst.msk [vmem:[#allocation2] sm:$0xff] %vm33_vm2, %v170_v52  ;;  %180 = vperm.xlu0 %269, %v170_v52  }
 0x1a1   :  { %v169_v55 = vpop.xlane.xlu1 %168 }
 0x1a2   :  { %v171_v56 = vmax.f32 %v165_v53, %v169_v55  ;;  %v174_v4 = vmul.f32 1.442695, %v172_v54 }
 0x1a4   :  { %v173_v57 = vsub.f32 %v165_v53, %v171_v56  ;;  %220 = vst.msk [vmem:[#allocation2 + $0x8] sm:$0xff] %vm33_vm2, %v171_v56  ;;  %185 = vperm.xlu1 %270, %v171_v56  }
 0x1a6   :  { %v176_v5 = vmul.f32 1.442695, %v173_v57 }
 0x1a7   :  { %v224_v26 = vld [vmem:[#allocation2] sm:$0xff] }
 0x1ab   :  { %v225_v32 = vld [vmem:[#allocation2 + $0x8] sm:$0xff] }
 0x21f   :  { %v181_v58 = vpop.permute.xlu0 %180 }
 0x220   :  { %v188_v59 = vsub.f32 %v162_v48, %v181_v58 }
 0x222   :  { %v190_v60 = vmul.f32 1.442695, %v188_v59 }
 0x223   :  { %v186_v61 = vpop.permute.xlu1 %185 }
 0x224   :  { %278 = vpow2.f32 %v190_v60  ;;  %v189_v62 = vsub.f32 %v163_v49, %v186_v61 }
 0x226   :  { %v192_v63 = vmul.f32 1.442695, %v189_v62 }
 0x228   :  { %280 = vpow2.f32 %v192_v63 }
 0x229   :  { %282 = vpow2.f32 %v174_v4 }
 0x22a   :  { %284 = vpow2.f32 %v176_v5 }
 0x22e   :  { %v279_v0 = vpop.eup %278 }
 0x22f   :  { %198 = vadd.xlane.f32.xlu0 %v279_v0 }
 0x232   :  { %v281_v1 = vpop.eup %280 }
 0x233   :  { %200 = vadd.xlane.f32.xlu1 %v281_v1  ;;  %211 = vadd.xlane.f32.xlu0 %v209_v2  ;;  %v283_v6 = vpop.eup %282 }
 0x234   :  { %v196_v8 = vmul.f32 %v283_v6, %v194_v7  ;;  %v285_v9 = vpop.eup %284 }
 0x235   :  { %v197_v14 = vmul.f32 %v285_v9, %v195_v11 }
 0x237   :  { %213 = vadd.xlane.f32.xlu0 %v210_v3 }
 0x2bc   :  { %v199_v10 = vpop.xlane.xlu0 %198 }
 0x2bd   :  { %v202_v12 = vadd.f32 %v199_v10, %v196_v8 }
 0x2bf   :  { %205 = vst.msk [vmem:[#allocation3] sm:$0xff] %vm33_vm2, %v202_v12 }
 0x2c0   :  { %v201_v15 = vpop.xlane.xlu1 %200  ;;  %v212_v16 = vpop.xlane.xlu0 %211 }
 0x2c1   :  { %v203_v17 = vadd.f32 %v201_v15, %v197_v14  ;;  %v215_v18 = vadd.f32 %v212_v16, %v207_v13 }
 0x2c3   :  { %206 = vst.msk [vmem:[#allocation3 + $0x8] sm:$0xff] %vm33_vm2, %v203_v17  ;;  %217 = vst.msk [vmem:[#allocation4] sm:$0xff] %vm33_vm2, %v215_v18 }
 0x2c4   :  { %v214_v20 = vpop.xlane.xlu0 %213 }
 0x2c5   :  { %v216_v21 = vadd.f32 %v214_v20, %v208_v19 }
 0x2c6   :  { %v226_v22 = vld [vmem:[#allocation3] sm:$0xff] }
 0x2c7   :  { %286 = vlog2.f32 %v226_v22  ;;  %218 = vst.msk [vmem:[#allocation4 + $0x8] sm:$0xff] %vm33_vm2, %v216_v21 }
 0x2ca   :  { %v227_v23 = vld [vmem:[#allocation3 + $0x8] sm:$0xff]  ;;  %v234_v29 = vld [vmem:[#allocation4] sm:$0xff] }
 0x2cb   :  { %288 = vlog2.f32 %v227_v23 }
 0x2ce   :  { %v235_v34 = vld [vmem:[#allocation4 + $0x8] sm:$0xff] }
 0x2d1   :  { %v287_v24 = vpop.eup %286 }
 0x2d2   :  { %v229_v25 = vmul.f32 0.6931472, %v287_v24 }
 0x2d4   :  { %v232_v27 = vadd.f32 %v229_v25, %v224_v26 }
 0x2d5   :  { %v289_v28 = vpop.eup %288 }
 0x2d6   :  { %v236_v30 = vsub.f32 %v232_v27, %v234_v29  ;;  %v231_v31 = vmul.f32 0.6931472, %v289_v28 }
 0x2d8   :  { %238 = vst.msk [vmem:[%s401_s3] sm:$0xff] %vm33_vm2, %v236_v30  ;;  %v233_v33 = vadd.f32 %v231_v31, %v225_v32 }
 0x2da   :  { %v237_v35 = vsub.f32 %v233_v33, %v235_v34 }
 0x2dc   :  { %239 = vst.msk [vmem:[%s401_s3 + $0x8] sm:$0xff] %vm33_vm2, %v237_v35 }
 0x2dd   :  { %244 = vsyncpa [#allocation6], 1 }

</bundles_post_ra>
